<compile_context>
chip_gen: v6e
topology: v6e:2x2x1
jax: 0.10.0
libtpu: 0.0.40
codegen_flags: <defaults>
</compile_context>

<pallas_src>
import jax
import jax.numpy as jnp
from jax.experimental import pallas as pl
from jax.experimental.pallas import tpu as pltpu

NUM_LAYERS = 10
FEAT = 10


def affine_kernel(x_ref, m_ref, c_ref, o_ref):
    # Single fused affine map: o = x @ M + c  (one vmatmul + one VPU add).
    x = x_ref[...]                                    # (R, F)
    m = m_ref[...]                                    # (F, F), already (in, out)
    c = c_ref[...]                                    # (1, F)
    y = jnp.dot(x, m, preferred_element_type=jnp.float32) + c
    o_ref[...] = y.astype(o_ref.dtype)


def _compose_affine(weights, biases):
    """Fold the 10-iteration chain into one (M, c) with x_out = x_in @ M + c.

    Per-iteration semantics (PyTorch Linear: y = x @ W^T + b):
        x <- x @ (W[i//2] + W[i])^T + (b[i//2] + b[i])
    """
    idx = jnp.arange(NUM_LAYERS) // 2
    wc = weights[idx] + weights           # (L, out, in) combined per-iter weights
    bc = biases[idx] + biases             # (L, out)     combined per-iter biases
    a = jnp.swapaxes(wc, 1, 2)            # (L, in, out) -- pre-transposed

    m = jnp.eye(FEAT, dtype=jnp.float32)
    c = jnp.zeros((FEAT,), dtype=jnp.float32)
    for i in range(NUM_LAYERS):           # batch-independent parameter preprocessing
        m = m @ a[i]
        c = c @ a[i] + bc[i]
    return m, c.reshape(1, FEAT)


@jax.jit
def modulelist_forward(x, weights, biases):
    """x: (..., 10) float32; weights: (10, 10, 10) (out, in); biases: (10, 10)."""
    orig_shape = x.shape
    x2d = x.reshape(-1, FEAT)             # (R, F)
    m, c = _compose_affine(weights, biases)
    out = pl.pallas_call(
        affine_kernel,
        out_shape=jax.ShapeDtypeStruct(x2d.shape, x2d.dtype),
        in_specs=[
            pl.BlockSpec(memory_space=pltpu.VMEM),
            pl.BlockSpec(memory_space=pltpu.VMEM),
            pl.BlockSpec(memory_space=pltpu.VMEM),
        ],
        out_specs=pl.BlockSpec(memory_space=pltpu.VMEM),
    )(x2d, m, c)
    return out.reshape(orig_shape)


def reference_forward(x, weights, biases):
    # Pure-JAX reference mirroring the PyTorch forward exactly (no folding).
    x2d = x.reshape(-1, FEAT)
    for i in range(NUM_LAYERS):
        j = i // 2
        x2d = (x2d @ weights[j].T + biases[j]) + (x2d @ weights[i].T + biases[i])
    return x2d.reshape(x.shape)


if __name__ == "__main__":
    key = jax.random.PRNGKey(0)
    kx, kw, kb = jax.random.split(key, 3)

    # Deterministic parameter init (PyTorch Linear default: U[-1/sqrt(in), 1/sqrt(in)]).
    bound = 1.0 / (FEAT ** 0.5)
    weights = jax.random.uniform(
        kw, (NUM_LAYERS, FEAT, FEAT), jnp.float32, minval=-bound, maxval=bound)
    biases = jax.random.uniform(
        kb, (NUM_LAYERS, FEAT), jnp.float32, minval=-bound, maxval=bound)

    # Input matching the module's example: (1, 1, 10, 10).
    x = jax.random.normal(kx, (1, 1, 10, 10), jnp.float32)

    out = jax.block_until_ready(modulelist_forward(x, weights, biases))
    ref = reference_forward(x, weights, biases)

    assert out.shape == x.shape
    # Folding changes FP rounding order vs the reference; differences are ~1e-6
    # relative, well inside tolerance.
    assert jnp.allclose(out, ref, rtol=1e-4, atol=1e-4), "mismatch vs reference"

    print("KERNEL_OK")
</pallas_src>

<mosaic_0001>
module attributes {stable_mosaic.version = 11 : i64} {
  func.func @affine_kernel(%arg0: memref<10x10xf32, #tpu.memory_space<vmem>>, %arg1: memref<10x10xf32, #tpu.memory_space<vmem>>, %arg2: memref<1x10xf32, #tpu.memory_space<vmem>>, %arg3: memref<10x10xf32, #tpu.memory_space<vmem>>) attributes {dimension_semantics = [], scalar_prefetch = 0 : i64, scratch_operands = 0 : i64, tpu.core_type = #tpu.core_type<tc>} {
    %c0 = arith.constant 0 : index
    %c0_0 = arith.constant 0 : index
    %0 = vector.load %arg0[%c0, %c0_0] : memref<10x10xf32, #tpu.memory_space<vmem>>, vector<10x10xf32>
    %c0_1 = arith.constant 0 : index
    %c0_2 = arith.constant 0 : index
    %1 = vector.load %arg1[%c0_1, %c0_2] : memref<10x10xf32, #tpu.memory_space<vmem>>, vector<10x10xf32>
    %c0_3 = arith.constant 0 : index
    %c0_4 = arith.constant 0 : index
    %2 = vector.load %arg2[%c0_3, %c0_4] : memref<1x10xf32, #tpu.memory_space<vmem>>, vector<1x10xf32>
    %cst = arith.constant dense<0.000000e+00> : vector<10x10xf32>
    %3 = tpu.matmul %0, %1, %cst {dimension_numbers = #tpu.dot_dimension_numbers<[1], [0], [0], [1], [0, 0, 1, 1], [], []>} : vector<10x10xf32>, vector<10x10xf32>, vector<10x10xf32> -> vector<10x10xf32>
    %4 = vector.broadcast %2 : vector<1x10xf32> to vector<10x10xf32>
    %5 = arith.addf %3, %4 : vector<10x10xf32>
    %c0_5 = arith.constant 0 : index
    %c0_6 = arith.constant 0 : index
    %6 = vector.load %arg3[%c0_5, %c0_6] : memref<10x10xf32, #tpu.memory_space<vmem>>, vector<10x10xf32>
    tpu.vector_store %arg3[%c0_5, %c0_6], %5 {strides = array<i32>} : memref<10x10xf32, #tpu.memory_space<vmem>>, vector<10x10xf32>,
    return
  }
}

</mosaic_0001>

<bundles_post_ra>
// kernel: modulelist_forward.1
= control target key start
LH: loop header
LB: loop body
LE: loop exit
PB: predicated region body
PF: predicated region fallthrough
CT: control target
= control target key end

     0   :  { %vm32_vm0 = vcmask 1041408   ;;  %vm25_vm1 = vcmask 80896   ;;  %vm112_vm2 = vcmask 74752   ;;  %s177_s1 = inlined_call_operand.vmem [shape: f32[10,10], index: 1, kind: input, shape index: {}]   ;;  %s178_s0 = inlined_call_operand.vmem [shape: f32[10,10], index: 0, kind: input, shape index: {}]   ;;  %s179_s2 = inlined_call_operand.vmem [shape: f32[1,10], index: 2, kind: input, shape index: {}]   ;;  %s180_s3 = inlined_call_operand.vmem [shape: f32[10,10], index: 3, kind: output, shape index: {}]  }
   0x1   :  { %v17_v0 = vld [vmem:[%s177_s1 + $0x8] sm:$0x3]  ;;  %v16_v1 = vld [vmem:[%s177_s1] sm:$0xff] }
   0x2   :  { %v14_v2 = vld [vmem:[%s178_s0] sm:$0xff]  ;;  %126 = vmatprep.subr.msk.mxu0 %vm32_vm0, %v17_v0  ;;  %v15_v3 = vld [vmem:[%s178_s0 + $0x8] sm:$0x3] }
   0x3   :  { %130 = vmatprep.mubr.msk.f32.mxu0 %vm25_vm1, %v14_v2  ;;  %127 = vmatpush3.msk.msra.mxu0 %vm32_vm0, %v17_v0  ;;  %v118_v4 = vld [vmem:[%s179_s2] ss:$0 sm:$0xff] }
   0x4   :  { %128 = vmatprep.subr.mxu0 %v16_v1 }
   0x5   :  { %129 = vmatpush3.msra.mxu0 %v16_v1 }
   0x6   :  { %131 = vmatmul.mubr.msk.f32.vlgmr.msra.gmra.mxu0 %vm25_vm1, %v15_v3 }
  0xc6   :  { %v132_v5 = vpop.f32.mrf.mxu0 }
  0xc7   :  { %v108_v6 = vadd.f32 %v132_v5, %v118_v4 }
  0xc8   :  { %v102_v7 = vpop.f32.mrf.mxu0 }
  0xc9   :  { %113 = vst.msk [vmem:[%s180_s3 + $0x8] sm:$0x3] %vm112_vm2, %v108_v6  ;;  %v103_v8 = vadd.f32 %v118_v4, %v102_v7 }
  0xcb   :  { %111 = vst.msk [vmem:[%s180_s3] sm:$0xff] %vm25_vm1, %v103_v8 }

</bundles_post_ra>
